<compile_context>
chip_gen: v7x
topology: tpu7x:2x2x1
jax: 0.10.0
libtpu: 0.0.40
codegen_flags: <defaults>
</compile_context>

<pallas_src>
import functools

import jax
import jax.numpy as jnp
from jax.experimental import pallas as pl
from jax.experimental.pallas import tpu as pltpu


def _attention_kernel(x_ref, wqkv_ref, wo_ref, bo_ref, out_ref, wts_ref, *,
                      heads, dim_head, scale):
    # x_ref:   (1, N, dim)        wqkv_ref: (dim, 3*inner)
    # wo_ref:  (inner, dim)       bo_ref:   (1, dim)
    # out_ref: (1, N, dim)        wts_ref:  (1, heads, N, N)
    inner = heads * dim_head
    x = x_ref[0]                                                        # (N, dim)

    # Fused q/k/v projection: one MXU push, 3*inner output lanes, f32 accumulate.
    qkv = jnp.dot(x, wqkv_ref[...], preferred_element_type=jnp.float32)  # (N, 3*inner)

    # Slices at multiples of `inner` lanes (128-aligned for the deployed config).
    # Fold the softmax scale into q (N*inner elems) instead of the (N, N) scores.
    q_all = qkv[:, :inner] * scale
    k_all = qkv[:, inner:2 * inner]
    v_all = qkv[:, 2 * inner:]

    outs = []
    for h in range(heads):  # heads is a small compile-time constant -> unrolled
        lo = h * dim_head
        q = q_all[:, lo:lo + dim_head]                                  # (N, dh)
        k = k_all[:, lo:lo + dim_head]
        v = v_all[:, lo:lo + dim_head]

        # Scores: contract the head dim of q and k directly (no transpose in VMEM).
        s = jax.lax.dot_general(q, k, (((1,), (1,)), ((), ())),
                                preferred_element_type=jnp.float32)     # (N, N)

        # Numerically stable softmax; reciprocal (exact) + multiply instead of N^2 divides.
        s = s - jnp.max(s, axis=-1, keepdims=True)
        e = jnp.exp(s)
        attn = e * pl.reciprocal(jnp.sum(e, axis=-1, keepdims=True))    # (N, N)

        wts_ref[0, h] = attn.astype(wts_ref.dtype)
        outs.append(jnp.dot(attn, v, preferred_element_type=jnp.float32))  # (N, dh)

    # Single output projection with K = inner (full MXU depth), then bias.
    out_cat = jnp.concatenate(outs, axis=-1)                            # (N, inner)
    proj = jnp.dot(out_cat, wo_ref[...], preferred_element_type=jnp.float32)
    out_ref[0] = (proj + bo_ref[...].astype(jnp.float32)).astype(out_ref.dtype)
    # nn.Dropout(p=0.0) in to_out is a no-op in train and eval -> skipped.


def attention(x, w_qkv, w_out, b_out, *, heads):
    """x: [B, N, dim]; w_qkv: [dim, 3*inner]; w_out: [inner, dim]; b_out: [dim]."""
    B, N, dim = x.shape
    inner = w_qkv.shape[1] // 3
    dh = inner // heads
    scale = float(dh) ** -0.5

    bo = b_out.reshape(1, dim)
    # TODO(synk): project_out=False (Identity to_out) path not exercised here;
    # wrapper assumes the Linear+Dropout projection path (true for these params).
    # TODO(synk): out last dim = dim (=32 here) stores are lane-masked; padding dim
    # to 128 lanes in the wrapper would lane-densify stores but adds a copy.

    itemsize = x.dtype.itemsize
    cost = pl.CostEstimate(
        flops=B * (2 * N * dim * 3 * inner            # fused q/k/v projection
                   + heads * 2 * 2 * N * N * dh       # q k^T and attn @ v
                   + 2 * N * inner * dim),            # output projection
        transcendentals=B * heads * N * N,            # exp in softmax
        bytes_accessed=(x.size + w_qkv.size + w_out.size + b_out.size
                        + B * N * dim) * itemsize + B * heads * N * N * 4)

    # Scoped-VMEM budget from the actual live blocks (weights are resident, x/out/wts
    # double-buffered, plus in-kernel f32 temporaries); floor at 32 MiB, cap below
    # v7x's 64 MiB physical VMEM.
    f32b = 4
    block_bytes = (
        4 * N * dim * itemsize                         # x in + out, double-buffered
        + 2 * heads * N * N * f32b                     # weights output, double-buffered
        + (w_qkv.size + w_out.size + b_out.size) * w_qkv.dtype.itemsize
        + (3 * N * inner + 3 * N * N * heads + N * inner + N * dim) * f32b)
    vmem_limit = int(min(max(2 * block_bytes, 32 << 20), 48 << 20))

    kernel = functools.partial(_attention_kernel, heads=heads, dim_head=dh,
                               scale=scale)

    out, weights = pl.pallas_call(
        kernel,
        out_shape=(jax.ShapeDtypeStruct((B, N, dim), x.dtype),
                   jax.ShapeDtypeStruct((B, heads, N, N), jnp.float32)),
        grid_spec=pltpu.PrefetchScalarGridSpec(
            num_scalar_prefetch=0,
            grid=(B,),
            in_specs=[
                pl.BlockSpec((1, N, dim), lambda b: (b, 0, 0)),        # x (per batch)
                pl.BlockSpec((dim, 3 * inner), lambda b: (0, 0)),      # fused Wqkv (resident)
                pl.BlockSpec((inner, dim), lambda b: (0, 0)),          # Wo (resident)
                pl.BlockSpec((1, dim), lambda b: (0, 0)),              # b_out (resident)
            ],
            out_specs=(
                pl.BlockSpec((1, N, dim), lambda b: (b, 0, 0)),        # out
                pl.BlockSpec((1, heads, N, N), lambda b: (b, 0, 0, 0)),  # attn weights
            ),
        ),
        compiler_params=pltpu.CompilerParams(
            dimension_semantics=("parallel",),   # batch axis shards across v7x's 2 TCs
            vmem_limit_bytes=vmem_limit),
        cost_estimate=cost,
    )(x, w_qkv, w_out, bo)

    return out, weights


def _ref_attention(x, w_qkv, w_out, b_out, heads):
    B, N, dim = x.shape
    inner = w_qkv.shape[1] // 3
    dh = inner // heads
    qkv = x @ w_qkv
    q, k, v = jnp.split(qkv, 3, axis=-1)
    reshape_heads = lambda t: t.reshape(B, N, heads, dh).transpose(0, 2, 1, 3)
    q, k, v = map(reshape_heads, (q, k, v))
    dots = jnp.einsum('bhnd,bhmd->bhnm', q, k) * (dh ** -0.5)
    attn = jax.nn.softmax(dots, axis=-1)
    out = jnp.einsum('bhnm,bhmd->bhnd', attn, v)
    out = out.transpose(0, 2, 1, 3).reshape(B, N, inner)
    out = out @ w_out + b_out
    return out, attn


if __name__ == "__main__":
    # Small shapes consistent with the module: dim=32, heads=2, dim_head=64.
    B, N, dim = 2, 8, 32
    heads, dim_head = 2, 64
    inner = heads * dim_head

    key = jax.random.PRNGKey(0)
    kx, kqkv, kwo, kbo = jax.random.split(key, 4)

    x = jax.random.normal(kx, (B, N, dim), dtype=jnp.float32)
    bound_qkv = 1.0 / (dim ** 0.5)
    bound_out = 1.0 / (inner ** 0.5)
    w_qkv = jax.random.uniform(kqkv, (dim, 3 * inner), jnp.float32,
                               -bound_qkv, bound_qkv)
    w_out = jax.random.uniform(kwo, (inner, dim), jnp.float32,
                               -bound_out, bound_out)
    b_out = jax.random.uniform(kbo, (dim,), jnp.float32, -bound_out, bound_out)

    out, weights = attention(x, w_qkv, w_out, b_out, heads=heads)
    out = jax.block_until_ready(out)
    weights = jax.block_until_ready(weights)

    ref_out, ref_w = _ref_attention(x, w_qkv, w_out, b_out, heads)
    assert out.shape == (B, N, dim)
    assert weights.shape == (B, heads, N, N)
    assert jnp.allclose(out, ref_out, atol=1e-5, rtol=1e-5)
    assert jnp.allclose(weights, ref_w, atol=1e-5, rtol=1e-5)

    print("KERNEL_OK")
</pallas_src>

<mosaic_0001>
module attributes {stable_mosaic.version = 11 : i64} {
  func.func @_attention_kernel(%arg0: i32, %arg1: memref<1x8x32xf32, #tpu.memory_space<vmem>>, %arg2: memref<32x384xf32, #tpu.memory_space<vmem>>, %arg3: memref<128x32xf32, #tpu.memory_space<vmem>>, %arg4: memref<1x32xf32, #tpu.memory_space<vmem>>, %arg5: memref<1x8x32xf32, #tpu.memory_space<vmem>>, %arg6: memref<1x2x8x8xf32, #tpu.memory_space<vmem>>) attributes {dimension_semantics = [#tpu.dimension_semantics<parallel>], iteration_bounds = array<i64: 2>, scalar_prefetch = 0 : i64, scratch_operands = 0 : i64, tpu.core_type = #tpu.core_type<tc>, window_params = [{transform_indices = @transform_0, window_bounds = array<i64: 1, 8, 32>}, {pipeline_mode = #tpu.pipeline_mode<synchronous>, transform_indices = @transform_1, window_bounds = array<i64: 32, 384>}, {pipeline_mode = #tpu.pipeline_mode<synchronous>, transform_indices = @transform_2, window_bounds = array<i64: 128, 32>}, {pipeline_mode = #tpu.pipeline_mode<synchronous>, transform_indices = @transform_3, window_bounds = array<i64: 1, 32>}, {transform_indices = @transform_4, window_bounds = array<i64: 1, 8, 32>}, {transform_indices = @transform_5, window_bounds = array<i64: 1, 2, 8, 8>}]} {
    %c0 = arith.constant 0 : index
    %c0_0 = arith.constant 0 : index
    %c0_1 = arith.constant 0 : index
    %0 = vector.load %arg1[%c0, %c0_0, %c0_1] : memref<1x8x32xf32, #tpu.memory_space<vmem>>, vector<1x8x32xf32>
    %1 = vector.shape_cast %0 : vector<1x8x32xf32> to vector<8x32xf32>
    %c0_2 = arith.constant 0 : index
    %c0_3 = arith.constant 0 : index
    %2 = vector.load %arg2[%c0_2, %c0_3] : memref<32x384xf32, #tpu.memory_space<vmem>>, vector<32x384xf32>
    %cst = arith.constant dense<0.000000e+00> : vector<8x384xf32>
    %3 = tpu.matmul %1, %2, %cst {dimension_numbers = #tpu.dot_dimension_numbers<[1], [0], [0], [1], [0, 0, 1, 1], [], []>} : vector<8x32xf32>, vector<32x384xf32>, vector<8x384xf32> -> vector<8x384xf32>
    %4 = vector.extract_strided_slice %3 {offsets = [0, 0], sizes = [8, 128], strides = [1, 1]} : vector<8x384xf32> to vector<8x128xf32>
    %cst_4 = arith.constant 1.250000e-01 : f32
    %5 = vector.broadcast %cst_4 : f32 to vector<8x128xf32>
    %6 = arith.mulf %4, %5 : vector<8x128xf32>
    %7 = vector.extract_strided_slice %3 {offsets = [0, 128], sizes = [8, 128], strides = [1, 1]} : vector<8x384xf32> to vector<8x128xf32>
    %8 = vector.extract_strided_slice %3 {offsets = [0, 256], sizes = [8, 128], strides = [1, 1]} : vector<8x384xf32> to vector<8x128xf32>
    %9 = vector.extract_strided_slice %6 {offsets = [0, 0], sizes = [8, 64], strides = [1, 1]} : vector<8x128xf32> to vector<8x64xf32>
    %10 = vector.extract_strided_slice %7 {offsets = [0, 0], sizes = [8, 64], strides = [1, 1]} : vector<8x128xf32> to vector<8x64xf32>
    %11 = vector.extract_strided_slice %8 {offsets = [0, 0], sizes = [8, 64], strides = [1, 1]} : vector<8x128xf32> to vector<8x64xf32>
    %cst_5 = arith.constant dense<0.000000e+00> : vector<8x8xf32>
    %12 = tpu.matmul %9, %10, %cst_5 {dimension_numbers = #tpu.dot_dimension_numbers<[1], [1], [0], [0], [0, 0, 1, 0], [], []>} : vector<8x64xf32>, vector<8x64xf32>, vector<8x8xf32> -> vector<8x8xf32>
    %cst_6 = arith.constant dense<0xFF800000> : vector<8xf32>
    %13 = vector.multi_reduction <maximumf>, %12, %cst_6 [1] : vector<8x8xf32> to vector<8xf32>
    %14 = vector.shape_cast %13 : vector<8xf32> to vector<8x1xf32>
    %15 = vector.broadcast %14 : vector<8x1xf32> to vector<8x8xf32>
    %16 = arith.subf %12, %15 : vector<8x8xf32>
    %17 = math.exp %16 : vector<8x8xf32>
    %cst_7 = arith.constant dense<0.000000e+00> : vector<8xf32>
    %18 = vector.multi_reduction <add>, %17, %cst_7 [1] : vector<8x8xf32> to vector<8xf32>
    %19 = vector.shape_cast %18 : vector<8xf32> to vector<8x1xf32>
    %20 = tpu.reciprocal %19 : vector<8x1xf32> -> vector<8x1xf32>
    %21 = vector.broadcast %20 : vector<8x1xf32> to vector<8x8xf32>
    %22 = arith.mulf %17, %21 : vector<8x8xf32>
    %c0_8 = arith.constant 0 : index
    %c0_9 = arith.constant 0 : index
    %c0_10 = arith.constant 0 : index
    %c0_11 = arith.constant 0 : index
    %23 = vector.load %arg6[%c0_8, %c0_9, %c0_10, %c0_11] : memref<1x2x8x8xf32, #tpu.memory_space<vmem>>, vector<1x1x8x8xf32>
    %24 = vector.shape_cast %23 : vector<1x1x8x8xf32> to vector<8x8xf32>
    %25 = vector.shape_cast %22 : vector<8x8xf32> to vector<1x1x8x8xf32>
    tpu.vector_store %arg6[%c0_8, %c0_9, %c0_10, %c0_11], %25 {strides = array<i32>} : memref<1x2x8x8xf32, #tpu.memory_space<vmem>>, vector<1x1x8x8xf32>,
    %cst_12 = arith.constant dense<0.000000e+00> : vector<8x64xf32>
    %26 = tpu.matmul %22, %11, %cst_12 {dimension_numbers = #tpu.dot_dimension_numbers<[1], [0], [0], [1], [0, 0, 1, 1], [], []>} : vector<8x8xf32>, vector<8x64xf32>, vector<8x64xf32> -> vector<8x64xf32>
    %27 = vector.extract_strided_slice %6 {offsets = [0, 64], sizes = [8, 64], strides = [1, 1]} : vector<8x128xf32> to vector<8x64xf32>
    %28 = vector.extract_strided_slice %7 {offsets = [0, 64], sizes = [8, 64], strides = [1, 1]} : vector<8x128xf32> to vector<8x64xf32>
    %29 = vector.extract_strided_slice %8 {offsets = [0, 64], sizes = [8, 64], strides = [1, 1]} : vector<8x128xf32> to vector<8x64xf32>
    %cst_13 = arith.constant dense<0.000000e+00> : vector<8x8xf32>
    %30 = tpu.matmul %27, %28, %cst_13 {dimension_numbers = #tpu.dot_dimension_numbers<[1], [1], [0], [0], [0, 0, 1, 0], [], []>} : vector<8x64xf32>, vector<8x64xf32>, vector<8x8xf32> -> vector<8x8xf32>
    %cst_14 = arith.constant dense<0xFF800000> : vector<8xf32>
    %31 = vector.multi_reduction <maximumf>, %30, %cst_14 [1] : vector<8x8xf32> to vector<8xf32>
    %32 = vector.shape_cast %31 : vector<8xf32> to vector<8x1xf32>
    %33 = vector.broadcast %32 : vector<8x1xf32> to vector<8x8xf32>
    %34 = arith.subf %30, %33 : vector<8x8xf32>
    %35 = math.exp %34 : vector<8x8xf32>
    %cst_15 = arith.constant dense<0.000000e+00> : vector<8xf32>
    %36 = vector.multi_reduction <add>, %35, %cst_15 [1] : vector<8x8xf32> to vector<8xf32>
    %37 = vector.shape_cast %36 : vector<8xf32> to vector<8x1xf32>
    %38 = tpu.reciprocal %37 : vector<8x1xf32> -> vector<8x1xf32>
    %39 = vector.broadcast %38 : vector<8x1xf32> to vector<8x8xf32>
    %40 = arith.mulf %35, %39 : vector<8x8xf32>
    %c0_16 = arith.constant 0 : index
    %c1 = arith.constant 1 : index
    %c0_17 = arith.constant 0 : index
    %c0_18 = arith.constant 0 : index
    %41 = vector.load %arg6[%c0_16, %c1, %c0_17, %c0_18] : memref<1x2x8x8xf32, #tpu.memory_space<vmem>>, vector<1x1x8x8xf32>
    %42 = vector.shape_cast %41 : vector<1x1x8x8xf32> to vector<8x8xf32>
    %43 = vector.shape_cast %40 : vector<8x8xf32> to vector<1x1x8x8xf32>
    tpu.vector_store %arg6[%c0_16, %c1, %c0_17, %c0_18], %43 {strides = array<i32>} : memref<1x2x8x8xf32, #tpu.memory_space<vmem>>, vector<1x1x8x8xf32>,
    %cst_19 = arith.constant dense<0.000000e+00> : vector<8x64xf32>
    %44 = tpu.matmul %40, %29, %cst_19 {dimension_numbers = #tpu.dot_dimension_numbers<[1], [0], [0], [1], [0, 0, 1, 1], [], []>} : vector<8x8xf32>, vector<8x64xf32>, vector<8x64xf32> -> vector<8x64xf32>
    %45 = tpu.concatenate %26, %44 in 1 : vector<8x64xf32>, vector<8x64xf32> -> vector<8x128xf32>
    %c0_20 = arith.constant 0 : index
    %c0_21 = arith.constant 0 : index
    %46 = vector.load %arg3[%c0_20, %c0_21] : memref<128x32xf32, #tpu.memory_space<vmem>>, vector<128x32xf32>
    %cst_22 = arith.constant dense<0.000000e+00> : vector<8x32xf32>
    %47 = tpu.matmul %45, %46, %cst_22 {dimension_numbers = #tpu.dot_dimension_numbers<[1], [0], [0], [1], [0, 0, 1, 1], [], []>} : vector<8x128xf32>, vector<128x32xf32>, vector<8x32xf32> -> vector<8x32xf32>
    %c0_23 = arith.constant 0 : index
    %c0_24 = arith.constant 0 : index
    %48 = vector.load %arg4[%c0_23, %c0_24] : memref<1x32xf32, #tpu.memory_space<vmem>>, vector<1x32xf32>
    %49 = vector.broadcast %48 : vector<1x32xf32> to vector<8x32xf32>
    %50 = arith.addf %47, %49 : vector<8x32xf32>
    %c0_25 = arith.constant 0 : index
    %c0_26 = arith.constant 0 : index
    %c0_27 = arith.constant 0 : index
    %51 = vector.load %arg5[%c0_25, %c0_26, %c0_27] : memref<1x8x32xf32, #tpu.memory_space<vmem>>, vector<1x8x32xf32>
    %52 = vector.shape_cast %51 : vector<1x8x32xf32> to vector<8x32xf32>
    %53 = vector.shape_cast %50 : vector<8x32xf32> to vector<1x8x32xf32>
    tpu.vector_store %arg5[%c0_25, %c0_26, %c0_27], %53 {strides = array<i32>} : memref<1x8x32xf32, #tpu.memory_space<vmem>>, vector<1x8x32xf32>,
    return
  }
  func.func @transform_0(%arg0: i32) -> (i32, i32, i32) {
    %c0_i32 = arith.constant 0 : i32
    %c0_i32_0 = arith.constant 0 : i32
    %c0_i32_1 = arith.constant 0 : i32
    return %arg0, %c0_i32, %c0_i32_0 : i32, i32, i32
  }
  func.func @transform_1(%arg0: i32) -> (i32, i32) {
    %c0_i32 = arith.constant 0 : i32
    %c0_i32_0 = arith.constant 0 : i32
    %c0_i32_1 = arith.constant 0 : i32
    return %c0_i32, %c0_i32_0 : i32, i32
  }
  func.func @transform_2(%arg0: i32) -> (i32, i32) {
    %c0_i32 = arith.constant 0 : i32
    %c0_i32_0 = arith.constant 0 : i32
    %c0_i32_1 = arith.constant 0 : i32
    return %c0_i32, %c0_i32_0 : i32, i32
  }
  func.func @transform_3(%arg0: i32) -> (i32, i32) {
    %c0_i32 = arith.constant 0 : i32
    %c0_i32_0 = arith.constant 0 : i32
    %c0_i32_1 = arith.constant 0 : i32
    return %c0_i32, %c0_i32_0 : i32, i32
  }
  func.func @transform_4(%arg0: i32) -> (i32, i32, i32) {
    %c0_i32 = arith.constant 0 : i32
    %c0_i32_0 = arith.constant 0 : i32
    %c0_i32_1 = arith.constant 0 : i32
    return %arg0, %c0_i32, %c0_i32_0 : i32, i32, i32
  }
  func.func @transform_5(%arg0: i32) -> (i32, i32, i32, i32) {
    %c0_i32 = arith.constant 0 : i32
    %c0_i32_0 = arith.constant 0 : i32
    %c0_i32_1 = arith.constant 0 : i32
    %c0_i32_2 = arith.constant 0 : i32
    return %arg0, %c0_i32, %c0_i32_0, %c0_i32_1 : i32, i32, i32, i32
  }
}

</mosaic_0001>

<bundles_post_ra>
// kernel: tpu_custom_call.1
= control target key start
LH: loop header
LB: loop body
LE: loop exit
PB: predicated region body
PF: predicated region fallthrough
CT: control target
= control target key end

     0   :  { %11 = vsyncpa [#allocation3], 0  ;;  %s1576_s0 = inlined_call_operand.vmem [shape: f32[2,8,32], index: 0, kind: input, shape index: {}]   ;;  %s1577_s1 = inlined_call_operand.vmem [shape: f32[32,384], index: 1, kind: input, shape index: {}]   ;;  %s1578_s2 = inlined_call_operand.vmem [shape: f32[128,32], index: 2, kind: input, shape index: {}]   ;;  %s1579_s3 = inlined_call_operand.vmem [shape: f32[1,32], index: 3, kind: input, shape index: {}]   ;;  %s1580_s4 = inlined_call_operand.hbm [shape: f32[2,8,32], index: 4, kind: output, shape index: {0}]   ;;  %s1581_s5 = inlined_call_operand.hbm [shape: f32[2,2,8,8], index: 5, kind: output, shape index: {1}]  }
   0x1   :  { %13 = vsyncpa [#allocation3 + $0x1], 0 }
   0x2   :  { %14 = vsyncpa [#allocation5], 0 }
   0x3   :  { %16 = vsyncpa [#allocation5 + $0x1], 0  ;;  %s1297_s18 = smov 0   ;;  %s1299_s19 = smov 0  }
   0x4   :  { %s1301_s20 = smov 0   ;;  %s1303_s21 = smov 0  }
   0x5 LB: > { %s1318_s22 = sadd.s32 4294967295, %s1257_s21   ;;  %s946_s23 = sadd.s32 4294967294, %s1257_s21   ;;  %s1257_s21 = sphi %s1303_s21, %s1587_s21   ;;  %s1253_s20 = sphi %s1301_s20, %s1586_s20   ;;  %s1249_s19 = sphi %s1299_s19, %s1585_s19   ;;  %s1245_s18 = sphi %s1297_s18, %s1584_s18  }
   0x6   : > { %s1322_s24 = sadd.s32 1, %s1257_s21   ;;  %s118_s25 = sadd.s32 1, %s1253_s20 }
   0x7   : > { %s115_s26 = ssub.s32 %s1257_s21, %s1322_s24  ;;  %p128_p0 = scmp.ne.s32.totalorder %s1253_s20, %s1249_s19 }
   0x8   : > { %p116_p1 = scmp.eq.s32.totalorder %s115_s26, 0  ;;  %p129_p2 = scmp.eq.s32.totalorder %s1318_s22, 1 }
   0x9   : > { %p134_p3 = scmp.ne.s32.totalorder %s1249_s19, %s1245_s18  ;;  %p135_p4 = scmp.eq.s32.totalorder %s946_s23, 1 }
   0xa   : > { %s1333_s27 = scalar_select %p116_p1, %s1253_s20, %s118_s25  }
   0xb   : > { %p1335_p5 = por %p129_p2, %p128_p0  ;;  %p1339_p6 = por %p135_p4, %p134_p3 }
   0xc   : > { %p949_p7 = scmp.ge.s32.totalorder %s1257_s21, 1  ;;  %p195_p8 = scmp.lt.s32.totalorder %s1257_s21, 3 }
   0xe   : > { %p196_p9 = pnand %p949_p7, %p195_p8 }
   0xf   : > { %v233_v0 = vld [vmem:[%s1577_s1 + $0x8] sm:$0xff] (!%p196_p9)  ;;  %v236_v1 = vld [vmem:[%s1577_s1 + $0x20] sm:$0xff] (!%p196_p9)  ;;  %p227_p10 = scmp.lt.s32.totalorder (!%p196_p9), %s1318_s22, 1  ;;  %v235_v4 = vld [vmem:[%s1577_s1 + $0x18] sm:$0xff] (!%p196_p9)  ;;  %v1259_v7 = vmov (!%p196_p9), 0.0   ;;  %v1260_v12 = vmov (!%p196_p9), 0.0|0.0  }
  0x10   : > { %199 = sbr.rel (%p196_p9) target bundleno = 1856 (0x740), region = 36  ;;  %v232_v2 = vld [vmem:[%s1577_s1] sm:$0xff] (!%p196_p9)  ;;  %v1067_v3 = vpack.c.bf16 (!%p196_p9), %v236_v1, %v233_v0  ;;  %v239_v5 = vld [vmem:[%s1577_s1 + $0x38] sm:$0xff] (!%p196_p9)  ;;  %v242_v6 = vld [vmem:[%s1577_s1 + $0x50] sm:$0xff] (!%p196_p9)  ;;  %312 = vmatprep.mubr.f32.mxu1 (!%p196_p9), %v1259_v7  ;;  %1081 = vmatprep.subr.bf16.mxu0 (!%p196_p9), %v1260_v12  ;;  %vm244_vm0 = vcmask (!%p196_p9), 261120   ;;  %vm1261_vm1 = vmmov (!%p196_p9), 0  }
  0x11   : > { %v1069_v8 = vpack.c.bf16 (!%p196_p9), %v235_v4, %v232_v2  ;;  %v1071_v9 = vpack.c.bf16 (!%p196_p9), %v242_v6, %v239_v5  ;;  %v238_v10 = vld [vmem:[%s1577_s1 + $0x30] sm:$0xff] (!%p196_p9)  ;;  %v241_v11 = vld [vmem:[%s1577_s1 + $0x48] sm:$0xff] (!%p196_p9)  ;;  %v240_v18 = vld [vmem:[%s1577_s1 + $0x40] sm:$0xff] (!%p196_p9)  ;;  %1064 = vmatprep.mubr.msk.f32.mxu0 (!%p196_p9), %vm1261_vm1, %v1259_v7  ;;  %vm390_vm2 = vcmask (!%p196_p9), 523264   ;;  %s1262_s23 = smov (!%p196_p9), 64   ;;  %vm467_vm3 = vcmask (!%p196_p9), 64512  }
  0x12   : > { %1068 = vmatprep.subr.bf16.mxu1 (!%p196_p9), %v1067_v3  ;;  %v1073_v13 = vpack.c.bf16 (!%p196_p9), %v241_v11, %v238_v10  ;;  %v234_v14 = vld [vmem:[%s1577_s1 + $0x10] sm:$0xff] (!%p196_p9)  ;;  %v237_v15 = vld [vmem:[%s1577_s1 + $0x28] sm:$0xff] (!%p196_p9)  ;;  %v243_v19 = vld [vmem:[%s1577_s1 + $0x58] sm:$0xff] (!%p196_p9)  ;;  %s1410_s25 = sand.u32 (!%p196_p9), 1, %s1249_s19   ;;  %s970_s12 = sshll.u32 (!%p196_p9), %s1318_s22, 8 }
  0x13   : > { %1070 = vmatpush1.bf16.msra.mxu1 (!%p196_p9), %v1069_v8  ;;  %v1076_v17 = vpack.c.bf16 (!%p196_p9), %v237_v15, %v234_v14  ;;  %v1079_v20 = vpack.c.bf16 (!%p196_p9), %v243_v19, %v240_v18  ;;  %s951_s26 = sshll.u32 (!%p196_p9), %s1410_s25, 4  ;;  %v726_v53 = vld [vmem:[%s1578_s2] sm:$0xff] (!%p196_p9)  ;;  %v727_v54 = vld [vmem:[%s1578_s2 + $0x8] sm:$0xff] (!%p196_p9)  ;;  %v728_v55 = vld [vmem:[%s1578_s2 + $0x10] sm:$0xff] (!%p196_p9)  ;;  %s1496_s16 = scalar_lea.hbm (!%p196_p9), %s1581_s5, %s970_s12 }
  0x14   : > { %1072 = vmatprep.subr.bf16.mxu1 (!%p196_p9), %v1071_v9  ;;  %v1082_v56 = vpack.c.bf16 (!%p196_p9), %v727_v54, %v726_v53  ;;  %v729_v57 = vld [vmem:[%s1578_s2 + $0x18] sm:$0xff] (!%p196_p9)  ;;  %v730_v59 = vld [vmem:[%s1578_s2 + $0x20] sm:$0xff] (!%p196_p9)  ;;  %v731_v60 = vld [vmem:[%s1578_s2 + $0x28] sm:$0xff] (!%p196_p9)  ;;  %s826_s17 = scalar_lea.sflag (!%p196_p9), [#allocation5], %s1410_s25 }
  0x15   : > { %v1085_v58 = vpack.c.bf16 (!%p196_p9), %v729_v57, %v728_v55  ;;  %v1088_v61 = vpack.c.bf16 (!%p196_p9), %v731_v60, %v730_v59  ;;  %v732_v62 = vld [vmem:[%s1578_s2 + $0x30] sm:$0xff] (!%p196_p9)  ;;  %v733_v63 = vld [vmem:[%s1578_s2 + $0x38] sm:$0xff] (!%p196_p9)  ;;  %v734_v1 = vld [vmem:[%s1578_s2 + $0x40] sm:$0xff] (!%p196_p9) }
  0x16   : > { %1083 = vmatpush3.bf16.msra.mxu0 (!%p196_p9), %v1082_v56  ;;  %v1091_v0 = vpack.c.bf16 (!%p196_p9), %v733_v63, %v732_v62  ;;  %v735_v2 = vld [vmem:[%s1578_s2 + $0x48] sm:$0xff] (!%p196_p9)  ;;  %v736_v4 = vld [vmem:[%s1578_s2 + $0x50] sm:$0xff] (!%p196_p9)  ;;  %v737_v5 = vld [vmem:[%s1578_s2 + $0x58] sm:$0xff] (!%p196_p9) }
  0x17   : > { %s228_s30 = scalar_select %p227_p10, %s1318_s22, 1  ;;  %1074 = vmatpush1.bf16.msra.mxu1 %v1073_v13  ;;  %1084 = vmatprep.subr.bf16.mxu0 %v1260_v12  ;;  %v1094_v3 = vpack.c.bf16 %v735_v2, %v734_v1  ;;  %v1097_v6 = vpack.c.bf16 %v737_v5, %v736_v4  ;;  %v739_v8 = vld [vmem:[%s1578_s2 + $0x68] sm:$0xff]  ;;  %v740_v10 = vld [vmem:[%s1578_s2 + $0x70] sm:$0xff]  ;;  %v741_v11 = vld [vmem:[%s1578_s2 + $0x78] sm:$0xff] }
  0x18   : > { %1075 = vmatprep.subr.bf16.mxu1 %v1260_v12  ;;  %v1103_v13 = vpack.c.bf16 %v741_v11, %v740_v10 }
  0x19   : > { %s952_s6 = sshll.u32 %s228_s30, 3  ;;  %s1414_s30 = scalar_lea.vmem [#allocation4], %s951_s26 }
  0x1a   : > { %s230_s9 = scalar_lea.vmem %s1576_s0, %s952_s6  ;;  %1086 = vmatpush3.bf16.msra.mxu0 %v1085_v58  ;;  %s852_s13 = sshll.u32 %s1414_s30, 4  ;;  %s1498_s13 = int_to_ptr.vmem [resolvable:$true] %s852_s13 }
  0x1b   : > { %v231_v16 = vld [vmem:[%s230_s9] sm:$0xff]  ;;  %1087 = vmatprep.subr.bf16.mxu0 %v1260_v12  ;;  %s1263_s26 = smov [#allocation4]  }
  0x1c   : > { %953 = vmatmul.mubr.msk.f32.vlgmr.msra.gmra.mrb[0].mxu1 %vm244_vm0, %v231_v16  ;;  %s1167_s6 = sshll.u32 %s1263_s26, 4  ;;  %s1168_s6 = int_to_ptr.vmem [resolvable:$false] %s1167_s6 }
  0x1d   : > { %1077 = vmatpush3.bf16.msra.mxu1 %v1076_v17  ;;  %1009 = vmatprep.mubr.msk.f32.mxu1 %vm1261_vm1, %v1259_v7  ;;  %p1170_p0 = scmp.lt.s32.totalorder %s1498_s13, %s1168_s6 }
  0x1e   : > { %1078 = vmatprep.subr.bf16.mxu1 %v1260_v12  ;;  %1089 = vmatpush3.bf16.msra.mxu0 %v1088_v61 }
  0x1f   : > { %1090 = vmatprep.subr.bf16.mxu0 %v1260_v12 }
  0x21   : > { %1080 = vmatpush3.bf16.msra.mxu1 %v1079_v20 }
  0x22   : > { %1012 = vmatprep.subr.mxu1 %v1259_v7  ;;  %1092 = vmatpush3.bf16.msra.mxu0 %v1091_v0 }
  0x23   : > { %1093 = vmatprep.subr.bf16.mxu0 %v1260_v12 }
  0x24   : > { %1010 = vmatmul.mubr.msk.f32.vlgmr.msra.gmra.mrb[2].mxu1 %vm244_vm0, %v231_v16 }
  0x25   : > { %1014 = vmatprep.mubr.msk.f32.mxu1 %vm1261_vm1, %v1259_v7 }
  0x26   : > { %1095 = vmatpush3.bf16.msra.mxu0 %v1094_v3 }
  0x27   : > { %1096 = vmatprep.subr.bf16.mxu0 %v1260_v12 }
  0x2a   : > { %1098 = vmatpush3.bf16.msra.mxu0 %v1097_v6 }
  0x2b   : > { %1099 = vmatprep.subr.bf16.mxu0 %v1260_v12 }
  0xef   : > { %v314_v21 = vpop.f32.mrb[0].mxu1 }
  0xf0   : > { %v316_v22 = vpop.f32.mrb[1].mxu1  ;;  %v389_v23 = vmul.f32 0.125, %v314_v21 }
  0xf1   : > { %555 = vrot.lane.b32.xlu1 %v316_v22, %s1262_s23  ;;  %1013 = vmatpush3.xpose.msk.msra.mxu1 %vm390_vm2, %v316_v22 }
  0xf2   : > { %1017 = vmatprep.subr.mxu1 %v1259_v7 }
  0xf4   : > { %1015 = vmatmul.mubr.msk.f32.vlgmr.msra.gmra.mrb[4].mxu1 %vm390_vm2, %v389_v23 }
  0xf5   : > { %553 = vrot.lane.b32.xlu1 %v389_v23, %s1262_s23  ;;  %1019 = vmatprep.mubr.msk.f32.mxu1 %vm1261_vm1, %v1259_v7 }
  0xf7   : > { %v385_v24 = vpop.f32.mrb[2].mxu1 }
  0xf8   : > { %v1011_v25 = vpop.f32.mrb[3].mxu1  ;;  %1018 = vmatpush3.msra.mxu1 %v385_v24 }
  0xf9   : > { %1022 = vmatprep.subr.mxu1 %v1259_v7 }
 0x163   : > { %v556_v36 = vpop.permute.xlu1 %555 }
 0x167   : > { %v554_v38 = vpop.permute.xlu1 %553 }
 0x1c7   : > { %v463_v26 = vpop.f32.mrb[4].mxu1 }
 0x1c8   : > { %v1016_v27 = vpop.f32.mrb[5].mxu1  ;;  %v468_v28 = vsel %vm467_vm3, %v463_v26, -inf }
 0x1c9   : > { %469 = vmax.xlane.f32.xlu0 %v468_v28 }
 0x256   : > { %v470_v29 = vpop.xlane.xlu0 %469 }
 0x257   : > { %v471_v30 = vsub.f32 %v463_v26, %v470_v29 }
 0x259   : > { %v472_v31 = vmul.f32 1.442695, %v471_v30 }
 0x25b   : > { %1155 = vpow2.f32 %v472_v31 }
 0x265   : > { %v1156_v32 = vpop.eup %1155 }
 0x266   : > { %v474_v33 = vsel %vm467_vm3, %v1156_v32, 0.0 }
 0x267   : > { %475 = vadd.xlane.f32.xlu0 %v474_v33 }
 0x2f4   : > { %v476_v34 = vpop.xlane.xlu0 %475 }
 0x2f5   : > { %1157 = vrcp.f32 %v476_v34 }
 0x2ff   : > { %v1158_v35 = vpop.eup %1157 }
 0x300   : > { %v478_v37 = vmul.f32 %v1158_v35, %v1156_v32 }
 0x302   : > { %1020 = vmatmul.mubr.msk.f32.vlgmr.msra.gmra.mrb[6].mxu1 %vm467_vm3, %v478_v37  ;;  %479 = vst.msk [vmem:[%s1414_s30] sm:$0xff] %vm467_vm3, %v478_v37 }
 0x303   : > { %1023 = vmatpush3.xpose.msk.msra.mxu1 %vm390_vm2, %v556_v36  ;;  %1024 = vmatprep.mubr.msk.f32.mxu1 %vm1261_vm1, %v1259_v7 }
 0x304   : > { %1027 = vmatprep.subr.mxu1 %v1259_v7 }
 0x306   : > { %1025 = vmatmul.mubr.msk.f32.vlgmr.msra.gmra.mrb[8].mxu1 %vm390_vm2, %v554_v38 }
 0x307   : > { %1029 = vmatprep.mubr.msk.f32.mxu1 %vm1261_vm1, %v1259_v7  ;;  %v738_v7 = vld [vmem:[%s1578_s2 + $0x60] sm:$0xff] }
 0x308   : > { %v1100_v9 = vpack.c.bf16 %v739_v8, %v738_v7 }
 0x30a   : > { %1101 = vmatpush3.bf16.msra.mxu0 %v1100_v9 }
 0x30b   : > { %1102 = vmatprep.subr.bf16.mxu0 %v1260_v12 }
 0x30e   : > { %1104 = vmatpush3.bf16.msra.mxu0 %v1103_v13 }
 0x3d5   : > { %v1425_v39 = vpop.f32.mrb[6].mxu1 }
 0x3d6   : > { %v1021_v40 = vpop.f32.mrb[7].mxu1 }
 0x3d9   : > { %v627_v41 = vpop.f32.mrb[8].mxu1 }
 0x3da   : > { %v1026_v42 = vpop.f32.mrb[9].mxu1  ;;  %v631_v43 = vsel %vm467_vm3, %v627_v41, -inf }
 0x3db   : > { %632 = vmax.xlane.f32.xlu0 %v631_v43 }
 0x3f1   : > { %645 = vrot.lane.b32.xlu0 %v385_v24, %s1262_s23 }
 0x468   : > { %v633_v44 = vpop.xlane.xlu0 %632 }
 0x469   : > { %v634_v45 = vsub.f32 %v627_v41, %v633_v44 }
 0x46b   : > { %v635_v46 = vmul.f32 1.442695, %v634_v45 }
 0x46c   : > { %v646_v47 = vpop.permute.xlu0 %645 }
 0x46d   : > { %1159 = vpow2.f32 %v635_v46  ;;  %1028 = vmatpush3.msra.mxu1 %v646_v47 }
 0x477   : > { %v1160_v48 = vpop.eup %1159 }
 0x478   : > { %v637_v49 = vsel %vm467_vm3, %v1160_v48, 0.0 }
 0x479   : > { %638 = vadd.xlane.f32.xlu1 %v637_v49 }
 0x506   : > { %v639_v50 = vpop.xlane.xlu1 %638 }
 0x507   : > { %1161 = vrcp.f32 %v639_v50 }
 0x511   : > { %v1162_v51 = vpop.eup %1161 }
 0x512   : > { %v641_v52 = vmul.f32 %v1162_v51, %v1160_v48 }
 0x514   : > { %1030 = vmatmul.mubr.msk.f32.vlgmr.msra.gmra.mrb[10].mxu1 %vm467_vm3, %v641_v52  ;;  %960 = vst.msk [vmem:[%s1414_s30 + $0x8] sm:$0xff] %vm467_vm3, %v641_v52  ;;  %s1169_s30 = scalar_lea.vmem %s1168_s6, 512 }
 0x5e7   : > { %v717_v14 = vpop.f32.mrb[10].mxu1 }
 0x5e8   : > { %722 = vrot.lane.b32.xlu0 %v717_v14, %s1262_s23  ;;  %v1031_v15 = vpop.f32.mrb[11].mxu1  ;;  %s1163_s23 = scalar_lea.vmem %s1498_s13, 256 }
 0x5e9   : > { %p1164_p11 = scmp.ne.s32.totalorder %s1498_s13, %s1163_s23  ;;  %p1171_p1 = scmp.lt.s32.totalorder %s1169_s30, %s1163_s23 }
 0x5eb   : > { %p1165_p12 = pnand %p1164_p11, %p1335_p5  ;;  %p1172_p2 = por %p1171_p1, %p1170_p0 }
 0x5ed   : > { %p1166_p13 = pneg %p1165_p12 }
 0x5ef   : > { %p1173_p3 = pnand %p1172_p2, %p1166_p13 }
 0x65a   : > { %v723_v16 = vpop.permute.xlu0 %722 }
 0x65b   : > { %v725_v17 = vsel %vm390_vm2, %v1425_v39, %v723_v16 }
 0x65c   : > { %1065 = vmatmul.mubr.f32.vlgmr.msra.gmra.mrb[0].mxu0 %v725_v17 }
 0x65d   : > { %1176 = shalt.err (!%p1173_p3)
}
 0x65e   : > { %s1177_s7 = scalar_lea.hbm %s1496_s16, 256  ;;  %s1181_s10 = scalar_lea.hbm %s1581_s5, 512 }
 0x65f   : > { %p1178_p4 = scmp.ne.s32.totalorder %s1496_s16, %s1177_s7  ;;  %p1182_p9 = scmp.lt.u32.totalorder %s1496_s16, %s1581_s5 }
 0x660   : > { %p1183_p10 = scmp.lt.u32.totalorder %s1181_s10, %s1177_s7  ;;  %p1185_p12 = scmp.lt.u32.totalorder %s1177_s7, %s1496_s16 }
 0x661   : > { %p1179_p7 = pnand %p1178_p4, %p1335_p5 }
 0x662   : > { %p1184_p11 = por %p1183_p10, %p1182_p9 }
 0x663   : > { %p1180_p8 = pneg %p1179_p7 }
 0x664   : > { %p1186_p13 = por %p1185_p12, %p1184_p11 }
 0x666   : > { %p1187_p0 = pnand %p1186_p13, %p1180_p8 }
 0x668   : > { %1190 = shalt.err (!%p1187_p0)
}
 0x669   : > { %s1264_s14 = smov 128   ;;  %s1265_s15 = smov 8   ;;  %v962_v12 = vld [vmem:[%s1579_s3] ss:$0 sm:$0xff] }
 0x66a   : > { %1106 = dma.vmem_to_hbm [thread:$0]  (%p1335_p5), %s1498_s13, 256, %s1496_s16, %s826_s17, %s1264_s14, %s1264_s14, %s1265_s15  }
 0x66b   : > { %s950_s23 = sshll.u32 %s1410_s25, 3  ;;  %s965_s30 = sshll.u32 %s1318_s22, 7 }
 0x66c   : > { %s219_s7 = scalar_lea.vmem [#allocation2], %s950_s23  ;;  %s1532_s11 = scalar_lea.hbm %s1580_s4, %s965_s30 }
 0x66d   : > { %s839_s8 = sshll.u32 %s219_s7, 4  ;;  %s821_s13 = scalar_lea.sflag [#allocation3], %s1410_s25  ;;  %s1534_s8 = int_to_ptr.vmem [resolvable:$true] %s839_s8 }
 0x66e   : > { %s1191_s16 = scalar_lea.vmem %s1534_s8, 128  ;;  %s1266_s22 = smov [#allocation2]  }
 0x66f   : > { %p1192_p1 = scmp.ne.s32.totalorder %s1534_s8, %s1191_s16  ;;  %s1195_s17 = sshll.u32 %s1266_s22, 4  ;;  %s1196_s17 = int_to_ptr.vmem [resolvable:$false] %s1195_s17 }
 0x670   : > { %s1197_s12 = scalar_lea.vmem %s1196_s17, 256  ;;  %p1198_p4 = scmp.lt.s32.totalorder %s1534_s8, %s1196_s17 }
 0x671   : > { %p1193_p2 = pnand %p1192_p1, %p1335_p5  ;;  %p1199_p7 = scmp.lt.s32.totalorder %s1197_s12, %s1191_s16 }
 0x673   : > { %p1194_p3 = pneg %p1193_p2  ;;  %p1200_p8 = por %p1199_p7, %p1198_p4 }
 0x675   : > { %p1201_p9 = pnand %p1200_p8, %p1194_p3 }
 0x72f   : > { %v815_v18 = vpop.f32.mrb[0].mxu0 }
 0x730   : > { %v816_v19 = vadd.f32 %v962_v12, %v815_v18  ;;  %v1066_v20 = vpop.f32.mrb[1].mxu0 }
 0x732   : > { %819 = vst.msk [vmem:[%s219_s7] sm:$0xff] %vm244_vm0, %v816_v19 }
 0x733   : > { %1204 = shalt.err (!%p1201_p9)
}
 0x734   : > { %s1205_s25 = scalar_lea.hbm %s1532_s11, 128  ;;  %s1209_s23 = scalar_lea.hbm %s1580_s4, 256 }
 0x735   : > { %p1206_p10 = scmp.ne.s32.totalorder %s1532_s11, %s1205_s25  ;;  %p1210_p13 = scmp.lt.u32.totalorder %s1532_s11, %s1580_s4 }
 0x736   : > { %p1211_p0 = scmp.lt.u32.totalorder %s1209_s23, %s1205_s25  ;;  %p1213_p2 = scmp.lt.u32.totalorder %s1205_s25, %s1532_s11 }
 0x737   : > { %p1207_p11 = pnand %p1206_p10, %p1335_p5 }
 0x738   : > { %p1212_p1 = por %p1211_p0, %p1210_p13 }
 0x739   : > { %p1208_p12 = pneg %p1207_p11 }
 0x73a   : > { %p1214_p3 = por %p1213_p2, %p1212_p1 }
 0x73c   : > { %p1215_p4 = pnand %p1214_p3, %p1208_p12 }
 0x73e   : > { %1218 = shalt.err (!%p1215_p4)
}
 0x73f   : > { %1105 = dma.vmem_to_hbm [thread:$0]  (%p1335_p5), %s1534_s8, 128, %s1532_s11, %s821_s13  }
 0x740 PF: > { %p1116_p7 = scmp.ge.s32.totalorder %s1257_s21, 2  ;;  %s867_s30 = sand.u32 1, %s1245_s18  }
 0x741   : > { %s868_s7 = scalar_lea.sflag [#allocation3], %s867_s30 }
 0x742   : > { %p1110_p8 = pnand %p1116_p7, %p1339_p6 }
 0x744   : > { %1236 = dma.done.wait (!%p1110_p8), %s868_s7, 128  }
 0x745   : > { %1238 = vsyncadd (!%p1110_p8), %s868_s7, 4294967168  ;;  %s877_s9 = scalar_lea.sflag [#allocation5], %s867_s30 }
 0x746   : > { %1240 = dma.done.wait (!%p1110_p8), %s877_s9, 256  }
 0x747   : > { %1242 = vsyncadd (!%p1110_p8), %s877_s9, 4294967040  ;;  %p19_p5 = scmp.ge.s32.totalorder %s1322_s24, 4   ;;  %s1584_s18 = smov %s1249_s19 }
 0x748   : > { %s1585_s19 = smov %s1253_s20  ;;  %s1586_s20 = smov %s1333_s27 }
 0x749   : > { %s1587_s21 = smov %s1322_s24  ;;  %21 = sbr.rel (!%p19_p5) target bundleno = 5 (0x5), region = 89 }
 0x750   :  { %882 = vsyncpa [#allocation3], 1 }
 0x751   :  { %884 = vsyncpa [#allocation3 + $0x1], 1 }
 0x752   :  { %885 = vsyncpa [#allocation5], 1 }
 0x753   :  { %887 = vsyncpa [#allocation5 + $0x1], 1 }

</bundles_post_ra>
